<compile_context>
chip_gen: v5e
topology: v5e:2x2
jax: 0.10.0
libtpu: 0.0.40
codegen_flags: <defaults>
</compile_context>

<pallas_src>
import jax
import jax.numpy as jnp
from jax.experimental import pallas as pl
from jax.experimental.pallas import tpu as pltpu


def _round_up(x, m):
    return ((x + m - 1) // m) * m


def _vmem_capacity_bytes():
    try:
        return int(pltpu.get_tpu_info().vmem_capacity_bytes)
    except Exception:
        return 128 * 1024 * 1024  # conservative default (v5e/v6e class)


def _pick_tile(dim, pref, unit):
    """Tile size: multiple of `unit`, <= pref; prefer one that exactly divides
    round_up(dim, unit) so the wrapper never pads/slices along that axis."""
    dim_r = _round_up(max(int(dim), 1), unit)
    pref = min(int(pref), dim_r)
    pref = max(unit, (pref // unit) * unit)
    cand = pref
    floor = max(unit, pref // 2)
    while cand >= floor:
        if dim_r % cand == 0:
            return cand
        cand -= unit
    return pref


# ----------------------------- kernels --------------------------------------


def _conv1d_small_kernel(x_ref, w_ref, b_ref, o_ref):
    # Whole problem in one VMEM block: x [M, nx], w [nx, nf], b [1, nf] (f32).
    acc = jnp.dot(x_ref[...], w_ref[...], preferred_element_type=jnp.float32)
    o_ref[...] = (acc + b_ref[...]).astype(o_ref.dtype)


def _conv1d_kernel_accout(x_ref, w_ref, b_ref, o_ref):
    # f32 output: accumulate directly into the resident output block
    # (out index_map ignores k, so the block stays in VMEM across the K axis).
    @pl.when(pl.program_id(2) == 0)
    def _seed_bias():
        o_ref[...] = jnp.broadcast_to(b_ref[...], o_ref.shape)

    o_ref[...] += jnp.dot(
        x_ref[...], w_ref[...], preferred_element_type=jnp.float32
    )


def _conv1d_kernel_scratch(x_ref, w_ref, b_ref, o_ref, acc_ref):
    # Non-f32 output: f32 VMEM accumulator, cast once on the last K step.
    k = pl.program_id(2)

    @pl.when(k == 0)
    def _seed_bias():
        acc_ref[...] = jnp.broadcast_to(b_ref[...], acc_ref.shape)

    acc_ref[...] += jnp.dot(
        x_ref[...], w_ref[...], preferred_element_type=jnp.float32
    )

    @pl.when(k == pl.num_programs(2) - 1)
    def _finalize():
        o_ref[...] = acc_ref[...].astype(o_ref.dtype)


# ----------------------------- wrapper --------------------------------------


def conv1d(x, w, b, *, tm=None, tn=None, tk=None, _force_tiled=False):
    """Pallas equivalent of Conv1D.forward (rf == 1).

    x: [..., nx]   w: [nx, nf]   b: [nf]   ->   [..., nf]
    Accumulation is always f32; operands may be f32 or bf16.
    """
    nx, nf = w.shape
    orig_shape = x.shape
    x2d = x.reshape(-1, nx)
    M = x2d.shape[0]
    out_dtype = x.dtype

    x_itemsize = jnp.dtype(x.dtype).itemsize
    w_itemsize = jnp.dtype(w.dtype).itemsize
    out_itemsize = jnp.dtype(out_dtype).itemsize

    # ---- small-problem fast path: one grid-less block, no padding/slicing ----
    small_bytes = (M * nx + nx * nf + M * nf) * 4 + nf * 4
    if (not _force_tiled) and small_bytes <= 8 * 1024 * 1024:
        b2d = b.reshape(1, nf).astype(jnp.float32)
        out2d = pl.pallas_call(
            _conv1d_small_kernel,
            out_shape=jax.ShapeDtypeStruct((M, nf), out_dtype),
        )(x2d, w, b2d)
        return out2d.reshape(*orig_shape[:-1], nf)

    # ---- tiled path -----------------------------------------------------------
    vmem_cap = _vmem_capacity_bytes()
    big_vmem = vmem_cap >= 96 * 1024 * 1024  # v5e/v6e = 128 MiB; v7x = 64 MiB per TC

    if tm is None or tn is None or tk is None:
        if x_itemsize <= 2:  # bf16 / fp8 / int8 operands
            dt_m, dt_n, dt_k = (1024, 2048, 512) if big_vmem else (512, 1024, 512)
        else:  # f32 operands
            dt_m, dt_n, dt_k = (512, 1024, 256) if big_vmem else (512, 512, 256)
        tm = tm or dt_m
        tn = tn or dt_n
        tk = tk or dt_k

    # Native sublane pack for the M tile: 8 (f32) / 16 (bf16) / 32 (int8/fp8).
    sub = max(8, 32 // x_itemsize)
    tm_e = _pick_tile(M, tm, sub)
    tn_e = _pick_tile(nf, tn, 128)
    tk_e = _pick_tile(nx, tk, 128)

    Mp = _round_up(M, tm_e)
    Np = _round_up(nf, tn_e)
    Kp = _round_up(nx, tk_e)

    # Megacore (v7x): ensure the two 'parallel' axes yield >= 2 blocks
    # (the K axis is 'arbitrary' and cannot be split across TensorCores).
    if (Mp // tm_e) * (Np // tn_e) == 1:
        if Np >= 256:
            tn_e = max(128, ((Np // 2) // 128) * 128)
            Np = _round_up(nf, tn_e)
        elif Mp >= 2 * sub:
            tm_e = max(sub, ((Mp // 2) // sub) * sub)
            Mp = _round_up(M, tm_e)

    # Zero padding.  K padding is required for correctness (0 * w == 0);
    # M/N padding, if any, is sliced off afterwards.  _pick_tile makes the
    # pads / slice no-ops in the common (aligned) case.
    x_p = x2d if (Mp == M and Kp == nx) else jnp.pad(x2d, ((0, Mp - M), (0, Kp - nx)))
    w_p = w if (Kp == nx and Np == nf) else jnp.pad(w, ((0, Kp - nx), (0, Np - nf)))
    b_p = b if Np == nf else jnp.pad(b, (0, Np - nf))
    b2d = b_p.reshape(1, Np).astype(jnp.float32)  # bias pre-cast once, outside kernel

    grid = (Mp // tm_e, Np // tn_e, Kp // tk_e)

    accumulate_in_out = out_dtype == jnp.float32
    kernel = _conv1d_kernel_accout if accumulate_in_out else _conv1d_kernel_scratch
    scratch = [] if accumulate_in_out else [pltpu.VMEM((tm_e, tn_e), jnp.float32)]

    # Double-buffered tiles (+ f32 accumulator when needed) + bias tile.
    vmem_est = (
        2 * (tm_e * tk_e * x_itemsize + tk_e * tn_e * w_itemsize + tm_e * tn_e * out_itemsize)
        + (0 if accumulate_in_out else tm_e * tn_e * 4)
        + 2 * tn_e * 4
    )
    # Chip-aware cap: ~76 MiB on 128-MiB parts, ~38 MiB on 64-MiB v7x.
    hard_cap = max(32 << 20, min(96 << 20, int(vmem_cap * 0.6)))
    vmem_limit = int(min(max(int(1.25 * vmem_est), 32 << 20), hard_cap))

    cost = pl.CostEstimate(
        flops=2 * M * nx * nf,
        transcendentals=0,
        bytes_accessed=(
            M * nx * x_itemsize + nx * nf * w_itemsize + nf * 4 + M * nf * out_itemsize
        ),
    )

    out_p = pl.pallas_call(
        kernel,
        out_shape=jax.ShapeDtypeStruct((Mp, Np), out_dtype),
        grid_spec=pltpu.PrefetchScalarGridSpec(
            num_scalar_prefetch=0,
            grid=grid,
            in_specs=[
                pl.BlockSpec((tm_e, tk_e), lambda i, j, k: (i, k)),  # x tile
                pl.BlockSpec((tk_e, tn_e), lambda i, j, k: (k, j)),  # weight tile (streamed)
                pl.BlockSpec((1, tn_e), lambda i, j, k: (0, j)),     # bias tile (f32)
            ],
            out_specs=pl.BlockSpec((tm_e, tn_e), lambda i, j, k: (i, j)),
            scratch_shapes=scratch,
        ),
        compiler_params=pltpu.CompilerParams(
            dimension_semantics=("parallel", "parallel", "arbitrary"),
            vmem_limit_bytes=vmem_limit,
        ),
        cost_estimate=cost,
    )(x_p, w_p, b2d)

    out2d = out_p if (Mp == M and Np == nf) else out_p[:M, :nf]
    return out2d.reshape(*orig_shape[:-1], nf)


if __name__ == "__main__":
    key = jax.random.PRNGKey(0)
    kx, kw, kx2, kw2 = jax.random.split(key, 4)

    # --- 1) module-sized example: Conv1D(nf=64, rf=1, nx=32), small fast path ---
    nx, nf = 32, 64
    batch, seq = 2, 8

    # Deterministic init mirroring the PyTorch __init__:
    #   w ~ Normal(0, 0.02) with shape (nx, nf);  b = zeros(nf)
    w = (0.02 * jax.random.normal(kw, (nx, nf))).astype(jnp.float32)
    b = jnp.zeros((nf,), dtype=jnp.float32)
    x = jax.random.normal(kx, (batch, seq, nx), dtype=jnp.float32)

    y = conv1d(x, w, b)
    jax.block_until_ready(y)
    y_ref = (x.reshape(-1, nx) @ w + b).reshape(batch, seq, nf)
    assert y.shape == (batch, seq, nf)
    assert jnp.allclose(y, y_ref, atol=1e-5, rtol=1e-5)

    # --- 2) exercise the tiled (3-D grid) path, f32, direct-output accumulation ---
    M2, nx2, nf2 = 256, 256, 384
    w2 = (0.02 * jax.random.normal(kw2, (nx2, nf2))).astype(jnp.float32)
    b2 = (0.02 * jax.random.normal(kw, (nf2,))).astype(jnp.float32)
    x2 = jax.random.normal(kx2, (M2, nx2), dtype=jnp.float32)
    y2 = conv1d(x2, w2, b2, _force_tiled=True)
    jax.block_until_ready(y2)
    y2_ref = x2 @ w2 + b2
    assert jnp.allclose(y2, y2_ref, atol=1e-4, rtol=1e-4)

    # --- 3) tiled path, bf16 operands (f32 scratch-accumulator kernel variant) ---
    x3 = x2.astype(jnp.bfloat16)
    w3 = w2.astype(jnp.bfloat16)
    y3 = conv1d(x3, w3, b2, _force_tiled=True)
    jax.block_until_ready(y3)
    y3_ref = x3.astype(jnp.float32) @ w3.astype(jnp.float32) + b2
    assert y3.dtype == jnp.bfloat16
    assert jnp.allclose(y3.astype(jnp.float32), y3_ref, atol=2e-2, rtol=2e-2)

    print("KERNEL_OK")
</pallas_src>

<mosaic_0001>
module attributes {stable_mosaic.version = 11 : i64} {
  func.func @_conv1d_small_kernel(%arg0: memref<16x32xf32, #tpu.memory_space<vmem>>, %arg1: memref<32x64xf32, #tpu.memory_space<vmem>>, %arg2: memref<1x64xf32, #tpu.memory_space<vmem>>, %arg3: memref<16x64xf32, #tpu.memory_space<vmem>>) attributes {dimension_semantics = [], scalar_prefetch = 0 : i64, scratch_operands = 0 : i64, tpu.core_type = #tpu.core_type<tc>} {
    %c0 = arith.constant 0 : index
    %c0_0 = arith.constant 0 : index
    %0 = vector.load %arg0[%c0, %c0_0] : memref<16x32xf32, #tpu.memory_space<vmem>>, vector<16x32xf32>
    %c0_1 = arith.constant 0 : index
    %c0_2 = arith.constant 0 : index
    %1 = vector.load %arg1[%c0_1, %c0_2] : memref<32x64xf32, #tpu.memory_space<vmem>>, vector<32x64xf32>
    %cst = arith.constant dense<0.000000e+00> : vector<16x64xf32>
    %2 = tpu.matmul %0, %1, %cst {dimension_numbers = #tpu.dot_dimension_numbers<[1], [0], [0], [1], [0, 0, 1, 1], [], []>} : vector<16x32xf32>, vector<32x64xf32>, vector<16x64xf32> -> vector<16x64xf32>
    %c0_3 = arith.constant 0 : index
    %c0_4 = arith.constant 0 : index
    %3 = vector.load %arg2[%c0_3, %c0_4] : memref<1x64xf32, #tpu.memory_space<vmem>>, vector<1x64xf32>
    %4 = vector.broadcast %3 : vector<1x64xf32> to vector<16x64xf32>
    %5 = arith.addf %2, %4 : vector<16x64xf32>
    %c0_5 = arith.constant 0 : index
    %c0_6 = arith.constant 0 : index
    %6 = vector.load %arg3[%c0_5, %c0_6] : memref<16x64xf32, #tpu.memory_space<vmem>>, vector<16x64xf32>
    tpu.vector_store %arg3[%c0_5, %c0_6], %5 {strides = array<i32>} : memref<16x64xf32, #tpu.memory_space<vmem>>, vector<16x64xf32>,
    return
  }
}

</mosaic_0001>

<bundles_post_ra>
// kernel: tpu_custom_call.1
= control target key start
LH: loop header
LB: loop body
LE: loop exit
PB: predicated region body
PF: predicated region fallthrough
CT: control target
= control target key end

     0   :  { %8 = vsyncpa [#allocation3], 0  ;;  %s246_s0 = inlined_call_operand.hbm [shape: f32[16,32], index: 0, kind: input, shape index: {}]   ;;  %s247_s1 = inlined_call_operand.hbm [shape: f32[32,64], index: 1, kind: input, shape index: {}]   ;;  %s248_s2 = inlined_call_operand.vmem [shape: f32[1,64], index: 2, kind: input, shape index: {}]   ;;  %s249_s3 = inlined_call_operand.hbm [shape: f32[16,64], index: 3, kind: output, shape index: {}]  }
   0x1   :  { %9 = vsyncpa [#allocation6], 0 }
   0x2   :  { %10 = vsyncpa [#allocation4], 0  ;;  %s15_s14 = sshll.u32 %s246_s0, 4  ;;  %s200_s15 = smov [#allocation2]   ;;  %s16_s14 = int_to_ptr.hbm [resolvable:$true] %s15_s14 }
   0x3   :  { %s17_s16 = sshll.u32 %s200_s15, 4  ;;  %s28_s19 = sshll.u32 %s247_s1, 4  ;;  %s18_s16 = int_to_ptr.vmem [resolvable:$true] %s17_s16  ;;  %s29_s19 = int_to_ptr.hbm [resolvable:$true] %s28_s19 }
   0x4   :  { %s201_s20 = smov 128   ;;  %s202_s21 = smov 8  }
   0x5   :  { %23 = dma.hbm_to_vmem [thread:$0]  %s16_s14, 256, %s18_s16, [#allocation3], %s201_s20, %s201_s20, %s202_s21  }
   0x6   :  { %s203_s22 = smov [#allocation5]  }
   0x7   :  { %s30_s23 = sshll.u32 %s203_s22, 4  ;;  %s31_s23 = int_to_ptr.vmem [resolvable:$true] %s30_s23 }
   0x8   :  { %36 = dma.hbm_to_vmem [thread:$0]  %s29_s19, 512, %s31_s23, [#allocation6], %s201_s20, %s201_s20, %s202_s21  }
   0x9   :  { %194 = dma.done.wait [#allocation3], 256  }
   0xa   :  { %195 = vsyncadd [#allocation3], 4294967040 }
   0xb   :  { %196 = dma.done.wait [#allocation6], 512  }
   0xc   :  { %197 = vsyncadd [#allocation6], 4294966784  ;;  %v52_v0 = vld [vmem:[#allocation5 + $0x18] sm:$0xff]  ;;  %v51_v1 = vld [vmem:[#allocation5 + $0x10] sm:$0xff]  ;;  %vm57_vm0 = vcmask 261120   ;;  %s204_s24 = smov [#allocation7]  }
   0xd   :  { %76 = vmatpush.msra.mxu0 %v52_v0  ;;  %112 = vmatpush.msra.mxu1 %v52_v0  ;;  %v50_v2 = vld [vmem:[#allocation5 + $0x8] sm:$0xff]  ;;  %v49_v3 = vld [vmem:[#allocation5] sm:$0xff]  ;;  %v47_v4 = vld [vmem:[#allocation2] sm:$0xff]  ;;  %s94_s25 = sshll.u32 %s204_s24, 4  ;;  %s96_s28 = sshll.u32 %s249_s3, 4  ;;  %vm87_vm1 = vcmask 523264   ;;  %s95_s25 = int_to_ptr.vmem [resolvable:$true] %s94_s25  ;;  %s97_s28 = int_to_ptr.hbm [resolvable:$true] %s96_s28 }
   0xe   :  { %v48_v5 = vld [vmem:[#allocation2 + $0x8] sm:$0xff]  ;;  %v121_v6 = vld [vmem:[%s248_s2] ss:$0 sm:$0xff] }
   0xf   :  { %77 = vmatpush.msra.mxu0 %v51_v1  ;;  %113 = vmatpush.msra.mxu1 %v51_v1 }
  0x11   :  { %78 = vmatpush.msra.mxu0 %v50_v2  ;;  %114 = vmatpush.msra.mxu1 %v50_v2 }
  0x13   :  { %79 = vmatpush.msra.mxu0 %v49_v3  ;;  %115 = vmatpush.msra.mxu1 %v49_v3 }
  0x14   :  { %110 = vmatmul.msk.f32.vlgmr.msra.gmra.mxu0 %vm57_vm0, %v47_v4  ;;  %111 = vmatmul.msk.f32.vlgmr.msra.gmra.mxu1 %vm57_vm0, %v48_v5 }
  0x91   :  { %v81_v7 = vpop.f32.mrf.mxu0  ;;  %v84_v8 = vpop.f32.mrf.mxu1 }
  0x92   :  { %v82_v9 = vadd.f32 %v121_v6, %v81_v7  ;;  %v85_v10 = vadd.f32 %v121_v6, %v84_v8 }
  0x94   :  { %88 = vst.msk [vmem:[#allocation7] sm:$0xff] %vm87_vm1, %v82_v9 }
  0x95   :  { %89 = vst.msk [vmem:[#allocation7 + $0x8] sm:$0xff] %vm87_vm1, %v85_v10 }
  0x96   :  { %102 = dma.vmem_to_hbm [thread:$0]  %s95_s25, 256, %s97_s28, [#allocation4], %s201_s20, %s201_s20, %s202_s21  }
  0x97   :  { %198 = dma.done.wait [#allocation4], 256  }
  0x98   :  { %199 = vsyncadd [#allocation4], 4294967040 }
  0x99   :  { %107 = vsyncpa [#allocation3], 1 }
  0x9a   :  { %108 = vsyncpa [#allocation6], 1 }
  0x9b   :  { %109 = vsyncpa [#allocation4], 1 }

</bundles_post_ra>
